<compile_context>
chip_gen: v7x
topology: tpu7x:2x2x1
jax: 0.10.0
libtpu: 0.0.40
codegen_flags: <defaults>
</compile_context>

<pallas_src>
import functools

import jax
import jax.numpy as jnp
from jax.experimental import pallas as pl
from jax.experimental.pallas import tpu as pltpu

_HAS_BUFFERED = hasattr(pl, "Buffered")


def gated_fusion_kernel(x1_ref, x2_ref, w1_ref, w2_ref, wg_ref,
                        b12_ref, bg_ref, o_ref, *, mxu_dtype):
    x1 = x1_ref[...]
    x2 = x2_ref[...]

    # First stage: two accumulating K=D MXU matmuls (no concat temp).
    x1m = x1.astype(mxu_dtype)
    x2m = x2.astype(mxu_dtype)
    h = (jnp.dot(x1m, w1_ref[...], preferred_element_type=jnp.float32)
         + jnp.dot(x2m, w2_ref[...], preferred_element_type=jnp.float32)
         + b12_ref[...])                                    # f32 (tm, D)

    # gate = sigmoid(h @ Wg + bg): bf16 MXU operands, f32 accumulate, f32 EUP.
    g_lin = jnp.dot(h.astype(mxu_dtype), wg_ref[...],
                    preferred_element_type=jnp.float32) + bg_ref[...]
    gate = jax.nn.sigmoid(g_lin)

    # fused = gate*x1 + (1-gate)*x2 == x2 + gate*(x1 - x2)   (f32 VPU blend)
    x1f = x1.astype(jnp.float32)
    x2f = x2.astype(jnp.float32)
    o_ref[...] = (x2f + gate * (x1f - x2f)).astype(o_ref.dtype)


def _vmem_budgets():
    """Generation-aware (budget, limit) in bytes.  Pure hardware query; if it
    is unavailable (e.g. no TPU attached at trace time) fall back to the most
    conservative generation (v7x, 64 MiB physical VMEM)."""
    try:
        cap = int(pltpu.get_tpu_info().vmem_capacity_bytes)
    except Exception:  # hardware query only — never masks kernel errors
        cap = 64 * 1024 * 1024
    if cap <= 64 * 1024 * 1024:            # v7x: 64 MiB physical
        return 40 * 1024 * 1024, 48 * 1024 * 1024, True
    # v5e / v6e: 128 MiB physical — big tiles reach ~85% of HBM roofline.
    return 80 * 1024 * 1024, 96 * 1024 * 1024, False


def _choose_tm(N, D, *, budget_bytes, in_bytes, out_bytes, mxu_bytes,
               weight_buffers, ensure_multi_step):
    """Largest row tile whose double-buffered I/O tiles + weights + live
    in-kernel intermediates fit in the VMEM budget."""
    weight_bytes = (3 * D * D * mxu_bytes + 2 * D * 4) * weight_buffers
    avail = max(budget_bytes - weight_bytes, 2 * 1024 * 1024)
    io_per_row = (2 * D * in_bytes + D * out_bytes) * 2        # x1,x2,out ×2buf
    interm_per_row = 6 * D * 4          # x1m/x2m, h, h_bf16, gate, x1f/x2f, fused
    tm = int(avail // (io_per_row + interm_per_row))
    tm = max(8, min(tm, 1024))
    if ensure_multi_step and N >= 16:   # >=2 grid steps: megacore + pipelining
        tm = min(tm, max(8, (pl.cdiv(N, 2) // 8) * 8))
    if tm >= N:
        return N                        # single tile; full-dim block is legal
    return (tm // 8) * 8                # multiple of 8 sublanes


def _const_spec(shape, single_buffer):
    index_map = lambda i: tuple(0 for _ in shape)
    if single_buffer and _HAS_BUFFERED:
        return pl.BlockSpec(shape, index_map, pipeline_mode=pl.Buffered(1))
    return pl.BlockSpec(shape, index_map)


def gated_fusion(x1, x2, w1, b1, w2, b2, wg, bg, *, tm=None,
                 use_bf16_matmul=True, out_dtype=None):
    """x1, x2: (N, D).  w*: PyTorch convention (D_out, D_in).  b*: (D,).

    MXU matmuls run in bf16 with f32 accumulation (set use_bf16_matmul=False
    for bit-closer f32 matmuls).  Pass bf16 x1/x2 and/or out_dtype=bf16 to
    halve HBM traffic; the in-kernel sigmoid/blend stays f32 regardless.
    """
    N, D = x1.shape
    out_dtype = x1.dtype if out_dtype is None else out_dtype
    mxu_dtype = jnp.bfloat16 if use_bf16_matmul else jnp.float32

    # --- Lane padding: make the feature dim a multiple of 128 so every output
    # store is an unmasked, lane-dense vst and MXU columns aren't wasted. ---
    Dp = pl.cdiv(D, 128) * 128
    pad = Dp - D
    if pad:
        x1p = jnp.pad(x1, ((0, 0), (0, pad)))
        x2p = jnp.pad(x2, ((0, 0), (0, pad)))
    else:
        x1p, x2p = x1, x2

    # Wrapper glue: transpose to (D_in, D_out), zero-pad, cast once to bf16;
    # pre-add the first-stage biases.
    def prep_w(w):
        return jnp.pad(w.T, ((0, pad), (0, pad))).astype(mxu_dtype)   # (Dp, Dp)

    w1t, w2t, wgt = prep_w(w1), prep_w(w2), prep_w(wg)
    b12 = jnp.pad(b1 + b2, (0, pad)).reshape(1, Dp).astype(jnp.float32)
    bg2 = jnp.pad(bg, (0, pad)).reshape(1, Dp).astype(jnp.float32)

    in_bytes = jnp.dtype(x1.dtype).itemsize
    out_bytes = jnp.dtype(out_dtype).itemsize
    mxu_bytes = jnp.dtype(mxu_dtype).itemsize

    # Single-buffer the constant-index weights/biases only when the second
    # buffer would cost meaningful VMEM (large D).
    single_buffer_weights = _HAS_BUFFERED and Dp >= 512
    weight_buffers = 1 if single_buffer_weights else 2

    budget, vmem_limit, is_v7x = _vmem_budgets()
    if tm is None:
        tm = _choose_tm(N, Dp, budget_bytes=budget, in_bytes=in_bytes,
                        out_bytes=out_bytes, mxu_bytes=mxu_bytes,
                        weight_buffers=weight_buffers,
                        ensure_multi_step=is_v7x)

    grid = (pl.cdiv(N, tm),)
    x_spec = pl.BlockSpec((tm, Dp), lambda i: (i, 0))
    in_specs = [
        x_spec, x_spec,
        _const_spec((Dp, Dp), single_buffer_weights),   # W1^T
        _const_spec((Dp, Dp), single_buffer_weights),   # W2^T
        _const_spec((Dp, Dp), single_buffer_weights),   # Wg^T
        _const_spec((1, Dp), single_buffer_weights),    # b1+b2
        _const_spec((1, Dp), single_buffer_weights),    # bg
    ]

    kernel = functools.partial(gated_fusion_kernel, mxu_dtype=mxu_dtype)
    out = pl.pallas_call(
        kernel,
        out_shape=jax.ShapeDtypeStruct((N, Dp), out_dtype),
        grid_spec=pltpu.PrefetchScalarGridSpec(
            num_scalar_prefetch=0,
            grid=grid,
            in_specs=in_specs,
            out_specs=pl.BlockSpec((tm, Dp), lambda i: (i, 0)),
        ),
        compiler_params=pltpu.CompilerParams(
            dimension_semantics=("parallel",),
            vmem_limit_bytes=vmem_limit,
        ),
    )(x1p, x2p, w1t, w2t, wgt, b12, bg2)

    return out[:, :D] if pad else out


def gated_fusion_ref(x1, x2, w1, b1, w2, b2, wg, bg, *, mxu_dtype=jnp.float32):
    c = lambda a: a.astype(mxu_dtype)
    h1 = jnp.dot(c(x1), c(w1).T, preferred_element_type=jnp.float32) + b1
    h2 = jnp.dot(c(x2), c(w2).T, preferred_element_type=jnp.float32) + b2
    g = jnp.dot(c(h1 + h2), c(wg).T, preferred_element_type=jnp.float32) + bg
    gate = jax.nn.sigmoid(g)
    return x2 + gate * (x1 - x2)


if __name__ == "__main__":
    key = jax.random.PRNGKey(0)
    N, D = 8, 32  # rows x input_dim

    ks = jax.random.split(key, 8)
    x1 = jax.random.normal(ks[0], (N, D), jnp.float32)
    x2 = jax.random.normal(ks[1], (N, D), jnp.float32)

    # nn.Linear-like uniform(-1/sqrt(D), 1/sqrt(D)) init.
    bound = 1.0 / jnp.sqrt(jnp.float32(D))
    w1 = jax.random.uniform(ks[2], (D, D), jnp.float32, -bound, bound)
    b1 = jax.random.uniform(ks[3], (D,), jnp.float32, -bound, bound)
    w2 = jax.random.uniform(ks[4], (D, D), jnp.float32, -bound, bound)
    b2 = jax.random.uniform(ks[5], (D,), jnp.float32, -bound, bound)
    wg = jax.random.uniform(ks[6], (D, D), jnp.float32, -bound, bound)
    bg = jax.random.uniform(ks[7], (D,), jnp.float32, -bound, bound)

    out = gated_fusion(x1, x2, w1, b1, w2, b2, wg, bg)
    out = jax.block_until_ready(out)
    assert out.shape == (N, D)

    # Matched-precision reference (bf16 MXU operands, f32 accumulation/blend).
    ref_bf16 = gated_fusion_ref(x1, x2, w1, b1, w2, b2, wg, bg,
                                mxu_dtype=jnp.bfloat16)
    assert jnp.allclose(out, ref_bf16, atol=2e-2, rtol=2e-2), \
        "mismatch vs matched-precision reference"

    # Full-f32 reference (PyTorch module semantics); loose tol for bf16 MXU ops.
    ref_f32 = gated_fusion_ref(x1, x2, w1, b1, w2, b2, wg, bg)
    assert jnp.allclose(out, ref_f32, atol=6e-2, rtol=6e-2), \
        "mismatch vs f32 reference"

    print("KERNEL_OK")
</pallas_src>

<mosaic_0001>
module attributes {stable_mosaic.version = 11 : i64} {
  func.func @gated_fusion_kernel(%arg0: i32, %arg1: memref<8x128xf32, #tpu.memory_space<vmem>>, %arg2: memref<8x128xf32, #tpu.memory_space<vmem>>, %arg3: memref<128x128xbf16, #tpu.memory_space<vmem>>, %arg4: memref<128x128xbf16, #tpu.memory_space<vmem>>, %arg5: memref<128x128xbf16, #tpu.memory_space<vmem>>, %arg6: memref<1x128xf32, #tpu.memory_space<vmem>>, %arg7: memref<1x128xf32, #tpu.memory_space<vmem>>, %arg8: memref<8x128xf32, #tpu.memory_space<vmem>>) attributes {dimension_semantics = [#tpu.dimension_semantics<parallel>], iteration_bounds = array<i64: 1>, scalar_prefetch = 0 : i64, scratch_operands = 0 : i64, tpu.core_type = #tpu.core_type<tc>, window_params = [{transform_indices = @transform_0, window_bounds = array<i64: 8, 128>}, {transform_indices = @transform_1, window_bounds = array<i64: 8, 128>}, {pipeline_mode = #tpu.pipeline_mode<synchronous>, transform_indices = @transform_2, window_bounds = array<i64: 128, 128>}, {pipeline_mode = #tpu.pipeline_mode<synchronous>, transform_indices = @transform_3, window_bounds = array<i64: 128, 128>}, {pipeline_mode = #tpu.pipeline_mode<synchronous>, transform_indices = @transform_4, window_bounds = array<i64: 128, 128>}, {pipeline_mode = #tpu.pipeline_mode<synchronous>, transform_indices = @transform_5, window_bounds = array<i64: 1, 128>}, {pipeline_mode = #tpu.pipeline_mode<synchronous>, transform_indices = @transform_6, window_bounds = array<i64: 1, 128>}, {transform_indices = @transform_7, window_bounds = array<i64: 8, 128>}]} {
    %c0 = arith.constant 0 : index
    %c0_0 = arith.constant 0 : index
    %0 = vector.load %arg1[%c0, %c0_0] : memref<8x128xf32, #tpu.memory_space<vmem>>, vector<8x128xf32>
    %c0_1 = arith.constant 0 : index
    %c0_2 = arith.constant 0 : index
    %1 = vector.load %arg2[%c0_1, %c0_2] : memref<8x128xf32, #tpu.memory_space<vmem>>, vector<8x128xf32>
    %2 = arith.truncf %0 : vector<8x128xf32> to vector<8x128xbf16>
    %3 = arith.truncf %1 : vector<8x128xf32> to vector<8x128xbf16>
    %c0_3 = arith.constant 0 : index
    %c0_4 = arith.constant 0 : index
    %4 = vector.load %arg3[%c0_3, %c0_4] : memref<128x128xbf16, #tpu.memory_space<vmem>>, vector<128x128xbf16>
    %cst = arith.constant dense<0.000000e+00> : vector<8x128xf32>
    %5 = tpu.matmul %2, %4, %cst {dimension_numbers = #tpu.dot_dimension_numbers<[1], [0], [0], [1], [0, 0, 1, 1], [], []>} : vector<8x128xbf16>, vector<128x128xbf16>, vector<8x128xf32> -> vector<8x128xf32>
    %c0_5 = arith.constant 0 : index
    %c0_6 = arith.constant 0 : index
    %6 = vector.load %arg4[%c0_5, %c0_6] : memref<128x128xbf16, #tpu.memory_space<vmem>>, vector<128x128xbf16>
    %cst_7 = arith.constant dense<0.000000e+00> : vector<8x128xf32>
    %7 = tpu.matmul %3, %6, %cst_7 {dimension_numbers = #tpu.dot_dimension_numbers<[1], [0], [0], [1], [0, 0, 1, 1], [], []>} : vector<8x128xbf16>, vector<128x128xbf16>, vector<8x128xf32> -> vector<8x128xf32>
    %8 = arith.addf %5, %7 : vector<8x128xf32>
    %c0_8 = arith.constant 0 : index
    %c0_9 = arith.constant 0 : index
    %9 = vector.load %arg6[%c0_8, %c0_9] : memref<1x128xf32, #tpu.memory_space<vmem>>, vector<1x128xf32>
    %10 = vector.broadcast %9 : vector<1x128xf32> to vector<8x128xf32>
    %11 = arith.addf %8, %10 : vector<8x128xf32>
    %12 = arith.truncf %11 : vector<8x128xf32> to vector<8x128xbf16>
    %c0_10 = arith.constant 0 : index
    %c0_11 = arith.constant 0 : index
    %13 = vector.load %arg5[%c0_10, %c0_11] : memref<128x128xbf16, #tpu.memory_space<vmem>>, vector<128x128xbf16>
    %cst_12 = arith.constant dense<0.000000e+00> : vector<8x128xf32>
    %14 = tpu.matmul %12, %13, %cst_12 {dimension_numbers = #tpu.dot_dimension_numbers<[1], [0], [0], [1], [0, 0, 1, 1], [], []>} : vector<8x128xbf16>, vector<128x128xbf16>, vector<8x128xf32> -> vector<8x128xf32>
    %c0_13 = arith.constant 0 : index
    %c0_14 = arith.constant 0 : index
    %15 = vector.load %arg7[%c0_13, %c0_14] : memref<1x128xf32, #tpu.memory_space<vmem>>, vector<1x128xf32>
    %16 = vector.broadcast %15 : vector<1x128xf32> to vector<8x128xf32>
    %17 = arith.addf %14, %16 : vector<8x128xf32>
    %18 = arith.negf %17 : vector<8x128xf32>
    %19 = math.exp %18 : vector<8x128xf32>
    %cst_15 = arith.constant 1.000000e+00 : f32
    %20 = vector.broadcast %cst_15 : f32 to vector<8x128xf32>
    %21 = arith.addf %20, %19 : vector<8x128xf32>
    %22 = arith.divf %20, %21 : vector<8x128xf32>
    %23 = arith.subf %0, %1 : vector<8x128xf32>
    %24 = arith.mulf %22, %23 : vector<8x128xf32>
    %25 = arith.addf %1, %24 : vector<8x128xf32>
    %c0_16 = arith.constant 0 : index
    %c0_17 = arith.constant 0 : index
    %26 = vector.load %arg8[%c0_16, %c0_17] : memref<8x128xf32, #tpu.memory_space<vmem>>, vector<8x128xf32>
    tpu.vector_store %arg8[%c0_16, %c0_17], %25 {strides = array<i32>} : memref<8x128xf32, #tpu.memory_space<vmem>>, vector<8x128xf32>,
    return
  }
  func.func @transform_0(%arg0: i32) -> (i32, i32) {
    %c0_i32 = arith.constant 0 : i32
    %c0_i32_0 = arith.constant 0 : i32
    return %arg0, %c0_i32 : i32, i32
  }
  func.func @transform_1(%arg0: i32) -> (i32, i32) {
    %c0_i32 = arith.constant 0 : i32
    %c0_i32_0 = arith.constant 0 : i32
    return %arg0, %c0_i32 : i32, i32
  }
  func.func @transform_2(%arg0: i32) -> (i32, i32) {
    %c0_i32 = arith.constant 0 : i32
    %c0_i32_0 = arith.constant 0 : i32
    %c0_i32_1 = arith.constant 0 : i32
    return %c0_i32, %c0_i32_0 : i32, i32
  }
  func.func @transform_3(%arg0: i32) -> (i32, i32) {
    %c0_i32 = arith.constant 0 : i32
    %c0_i32_0 = arith.constant 0 : i32
    %c0_i32_1 = arith.constant 0 : i32
    return %c0_i32, %c0_i32_0 : i32, i32
  }
  func.func @transform_4(%arg0: i32) -> (i32, i32) {
    %c0_i32 = arith.constant 0 : i32
    %c0_i32_0 = arith.constant 0 : i32
    %c0_i32_1 = arith.constant 0 : i32
    return %c0_i32, %c0_i32_0 : i32, i32
  }
  func.func @transform_5(%arg0: i32) -> (i32, i32) {
    %c0_i32 = arith.constant 0 : i32
    %c0_i32_0 = arith.constant 0 : i32
    %c0_i32_1 = arith.constant 0 : i32
    return %c0_i32, %c0_i32_0 : i32, i32
  }
  func.func @transform_6(%arg0: i32) -> (i32, i32) {
    %c0_i32 = arith.constant 0 : i32
    %c0_i32_0 = arith.constant 0 : i32
    %c0_i32_1 = arith.constant 0 : i32
    return %c0_i32, %c0_i32_0 : i32, i32
  }
  func.func @transform_7(%arg0: i32) -> (i32, i32) {
    %c0_i32 = arith.constant 0 : i32
    %c0_i32_0 = arith.constant 0 : i32
    return %arg0, %c0_i32 : i32, i32
  }
}

</mosaic_0001>

<bundles_post_ra>
// kernel: tpu_custom_call.1
= control target key start
LH: loop header
LB: loop body
LE: loop exit
PB: predicated region body
PF: predicated region fallthrough
CT: control target
= control target key end

     0   :  { %12 = vsyncpa [#allocation3], 0  ;;  %s916_s0 = inlined_call_operand.hbm [shape: f32[8,128], index: 0, kind: input, shape index: {}]   ;;  %s917_s1 = inlined_call_operand.hbm [shape: f32[8,128], index: 1, kind: input, shape index: {}]   ;;  %s918_s2 = inlined_call_operand.hbm [shape: bf16[128,128], index: 2, kind: input, shape index: {}]   ;;  %s919_s3 = inlined_call_operand.hbm [shape: bf16[128,128], index: 3, kind: input, shape index: {}]   ;;  %s920_s4 = inlined_call_operand.hbm [shape: bf16[128,128], index: 4, kind: input, shape index: {}]   ;;  %s921_s5 = inlined_call_operand.vmem [shape: f32[1,128], index: 5, kind: input, shape index: {}]   ;;  %s922_s6 = inlined_call_operand.vmem [shape: f32[1,128], index: 6, kind: input, shape index: {}]   ;;  %s923_s7 = inlined_call_operand.hbm [shape: f32[8,128], index: 7, kind: output, shape index: {}]  }
   0x1   :  { %13 = vsyncpa [#allocation6], 0 }
   0x2   :  { %14 = vsyncpa [#allocation9], 0 }
   0x3   :  { %15 = vsyncpa [#allocation4], 0  ;;  %s743_s24 = smov [#allocation5]   ;;  %s603_s28 = scalar_lea.hbm %s917_s1, 128 }
   0x4   :  { %s32_s25 = sshll.u32 %s743_s24, 4  ;;  %p604_p0 = scmp.ne.s32.totalorder %s917_s1, %s603_s28  ;;  %s33_s25 = int_to_ptr.vmem [resolvable:$true] %s32_s25 }
   0x5   :  { %p607_p1 = scmp.lt.u32.totalorder %s603_s28, %s917_s1 }
   0x7   :  { %p609_p2 = pnand %p607_p1, %p604_p0 }
   0x9   :  { %612 = shalt.err (!%p609_p2)
}
   0xa   :  { %s613_s10 = scalar_lea.vmem %s33_s25, 128  ;;  %p618_p4 = scmp.lt.s32.totalorder %s33_s25, %s33_s25 }
   0xb   :  { %p614_p3 = scmp.ne.s32.totalorder %s33_s25, %s613_s10  ;;  %p619_p5 = scmp.lt.s32.totalorder %s613_s10, %s613_s10 }
   0xd   :  { %p620_p6 = por %p619_p5, %p618_p4 }
   0xf   :  { %p621_p7 = pnand %p620_p6, %p614_p3 }
  0x11   :  { %624 = shalt.err (!%p621_p7)
}
  0x12   :  { %35 = dma.hbm_to_vmem [thread:$0]  %s917_s1, 128, %s33_s25, [#allocation6]  }
  0x13   :  { %s744_s13 = smov [#allocation8]   ;;  %s745_s15 = smov [#allocation2]  }
  0x14   :  { %s53_s14 = sshll.u32 %s744_s13, 4  ;;  %s22_s16 = sshll.u32 %s745_s15, 4  ;;  %s54_s14 = int_to_ptr.vmem [resolvable:$true] %s53_s14  ;;  %s23_s16 = int_to_ptr.vmem [resolvable:$true] %s22_s16 }
  0x15   :  { %s625_s19 = scalar_lea.hbm %s919_s3, 1024 }
  0x16   :  { %p626_p8 = scmp.ne.s32.totalorder %s919_s3, %s625_s19  ;;  %p629_p9 = scmp.lt.u32.totalorder %s625_s19, %s919_s3 }
  0x18   :  { %p631_p10 = pnand %p629_p9, %p626_p8 }
  0x1a   :  { %634 = shalt.err (!%p631_p10)
}
  0x1b   :  { %s635_s1 = scalar_lea.vmem %s54_s14, 1024  ;;  %p640_p12 = scmp.lt.s32.totalorder %s54_s14, %s54_s14 }
  0x1c   :  { %p636_p11 = scmp.ne.s32.totalorder %s54_s14, %s635_s1  ;;  %p641_p13 = scmp.lt.s32.totalorder %s635_s1, %s635_s1 }
  0x1e   :  { %p642_p0 = por %p641_p13, %p640_p12 }
  0x20   :  { %p643_p1 = pnand %p642_p0, %p636_p11 }
  0x22   :  { %646 = shalt.err (!%p643_p1)
}
  0x23   :  { %s746_s24 = smov 64   ;;  %s747_s25 = smov 4  }
  0x24   :  { %59 = dma.hbm_to_vmem [thread:$0]  %s919_s3, 1024, %s54_s14, [#allocation9], %s746_s24, %s746_s24, %s747_s25  }
  0x25   :  { %s647_s30 = scalar_lea.hbm %s916_s0, 128 }
  0x26   :  { %p648_p2 = scmp.ne.s32.totalorder %s916_s0, %s647_s30  ;;  %p651_p3 = scmp.lt.u32.totalorder %s647_s30, %s916_s0 }
  0x28   :  { %p653_p4 = pnand %p651_p3, %p648_p2 }
  0x2a   :  { %656 = shalt.err (!%p653_p4)
}
  0x2b   :  { %s657_s12 = scalar_lea.vmem %s23_s16, 128  ;;  %p662_p6 = scmp.lt.s32.totalorder %s23_s16, %s23_s16 }
  0x2c   :  { %p658_p5 = scmp.ne.s32.totalorder %s23_s16, %s657_s12  ;;  %p663_p7 = scmp.lt.s32.totalorder %s657_s12, %s657_s12 }
  0x2e   :  { %p664_p8 = por %p663_p7, %p662_p6 }
  0x30   :  { %p665_p9 = pnand %p664_p8, %p658_p5 }
  0x32   :  { %668 = shalt.err (!%p665_p9)
}
  0x33   :  { %25 = dma.hbm_to_vmem [thread:$0]  %s916_s0, 128, %s23_s16, [#allocation3]  }
  0x34   :  { %s748_s14 = smov [#allocation7]   ;;  %s749_s17 = smov [#allocation10]  }
  0x35   :  { %s41_s15 = sshll.u32 %s748_s14, 4  ;;  %s65_s18 = sshll.u32 %s749_s17, 4  ;;  %s42_s15 = int_to_ptr.vmem [resolvable:$true] %s41_s15  ;;  %s66_s18 = int_to_ptr.vmem [resolvable:$true] %s65_s18 }
  0x36   :  { %s669_s21 = scalar_lea.hbm %s918_s2, 1024 }
  0x37   :  { %p670_p10 = scmp.ne.s32.totalorder %s918_s2, %s669_s21  ;;  %p673_p11 = scmp.lt.u32.totalorder %s669_s21, %s918_s2 }
  0x39   :  { %p675_p12 = pnand %p673_p11, %p670_p10 }
  0x3b   :  { %678 = shalt.err (!%p675_p12)
}
  0x3c   :  { %s679_s0 = scalar_lea.vmem %s42_s15, 1024  ;;  %p684_p0 = scmp.lt.s32.totalorder %s42_s15, %s42_s15 }
  0x3d   :  { %p680_p13 = scmp.ne.s32.totalorder %s42_s15, %s679_s0  ;;  %p685_p1 = scmp.lt.s32.totalorder %s679_s0, %s679_s0 }
  0x3f   :  { %p686_p2 = por %p685_p1, %p684_p0 }
  0x41   :  { %p687_p3 = pnand %p686_p2, %p680_p13 }
  0x43   :  { %690 = shalt.err (!%p687_p3)
}
  0x44   :  { %47 = dma.hbm_to_vmem [thread:$0]  %s918_s2, 1024, %s42_s15, [#allocation6], %s746_s24, %s746_s24, %s747_s25  }
  0x45   :  { %s691_s30 = scalar_lea.hbm %s920_s4, 1024 }
  0x46   :  { %p692_p4 = scmp.ne.s32.totalorder %s920_s4, %s691_s30  ;;  %p695_p5 = scmp.lt.u32.totalorder %s691_s30, %s920_s4 }
  0x48   :  { %p697_p6 = pnand %p695_p5, %p692_p4 }
  0x4a   :  { %700 = shalt.err (!%p697_p6)
}
  0x4b   :  { %s701_s12 = scalar_lea.vmem %s66_s18, 1024  ;;  %p706_p8 = scmp.lt.s32.totalorder %s66_s18, %s66_s18 }
  0x4c   :  { %p702_p7 = scmp.ne.s32.totalorder %s66_s18, %s701_s12  ;;  %p707_p9 = scmp.lt.s32.totalorder %s701_s12, %s701_s12 }
  0x4e   :  { %p708_p10 = por %p707_p9, %p706_p8 }
  0x50   :  { %p709_p11 = pnand %p708_p10, %p702_p7 }
  0x52   :  { %712 = shalt.err (!%p709_p11)
}
  0x53   :  { %71 = dma.hbm_to_vmem [thread:$0]  %s920_s4, 1024, %s66_s18, [#allocation9], %s746_s24, %s746_s24, %s747_s25  }
  0x54   :  { %735 = dma.done.wait [#allocation3], 128  }
  0x55   :  { %736 = vsyncadd [#allocation3], 4294967168 }
  0x56   :  { %737 = dma.done.wait [#allocation6], 1152  }
  0x57   :  { %738 = vsyncadd [#allocation6], 4294966144 }
  0x58   :  { %739 = dma.done.wait [#allocation9], 2048  }
  0x59   :  { %740 = vsyncadd [#allocation9], 4294965248  ;;  %v750_v0 = vmov 0.0   ;;  %vm751_vm0 = vmmov 0   ;;  %v575_v1 = vld [vmem:[#allocation8] sm:$0xff]   ;;  %v577_v3 = vld [vmem:[#allocation8 + $0x8] sm:$0xff]  }
  0x5a   :  { %505 = vmatprep.subr.bf16.mxu0 %v750_v0  ;;  %525 = vmatprep.subr.bf16.mxu1 %v750_v0  ;;  %v576_v2 = vld [vmem:[#allocation7] sm:$0xff]   ;;  %v578_v4 = vld [vmem:[#allocation7 + $0x8] sm:$0xff]   ;;  %v579_v5 = vld [vmem:[#allocation8 + $0x10] sm:$0xff]  }
  0x5b   :  { %521 = vmatprep.mubr.msk.bf16.mxu0 %vm751_vm0, %v750_v0  ;;  %541 = vmatprep.mubr.msk.bf16.mxu1 %vm751_vm0, %v750_v0  ;;  %v580_v6 = vld [vmem:[#allocation7 + $0x10] sm:$0xff]   ;;  %v581_v7 = vld [vmem:[#allocation8 + $0x18] sm:$0xff]   ;;  %v583_v9 = vld [vmem:[#allocation8 + $0x20] sm:$0xff]  }
  0x5c   :  { %506 = vmatpush3.bf16.msra.mxu0 %v575_v1  ;;  %526 = vmatpush3.bf16.msra.mxu1 %v576_v2  ;;  %v582_v8 = vld [vmem:[#allocation7 + $0x18] sm:$0xff]   ;;  %v584_v10 = vld [vmem:[#allocation7 + $0x20] sm:$0xff]   ;;  %v585_v11 = vld [vmem:[#allocation8 + $0x28] sm:$0xff]  }
  0x5d   :  { %507 = vmatprep.subr.bf16.mxu0 %v750_v0  ;;  %527 = vmatprep.subr.bf16.mxu1 %v750_v0  ;;  %v586_v12 = vld [vmem:[#allocation7 + $0x28] sm:$0xff]   ;;  %v587_v13 = vld [vmem:[#allocation8 + $0x30] sm:$0xff]   ;;  %v589_v15 = vld [vmem:[#allocation8 + $0x38] sm:$0xff]  }
  0x5e   :  { %v588_v14 = vld [vmem:[#allocation7 + $0x30] sm:$0xff]   ;;  %v880_v16 = vld [vmem:[#allocation5] sm:$0xff]  ;;  %v591_v21 = vld [vmem:[#allocation10] sm:$0xff]  }
  0x5f   :  { %v590_v17 = vld [vmem:[#allocation7 + $0x38] sm:$0xff]   ;;  %v92_v18 = vld [vmem:[#allocation2] sm:$0xff]  ;;  %v95_v19 = vpack.c.bf16 %v880_v16, %v880_v16  ;;  %v592_v22 = vld [vmem:[#allocation10 + $0x8] sm:$0xff]  }
  0x60   :  { %508 = vmatpush3.bf16.msra.mxu0 %v577_v3  ;;  %528 = vmatpush3.bf16.msra.mxu1 %v578_v4  ;;  %v94_v20 = vpack.c.bf16 %v92_v18, %v92_v18  ;;  %v593_v23 = vld [vmem:[#allocation10 + $0x10] sm:$0xff]   ;;  %v594_v24 = vld [vmem:[#allocation10 + $0x18] sm:$0xff]   ;;  %v595_v25 = vld [vmem:[#allocation10 + $0x20] sm:$0xff]   ;;  %v430_v50 = vsub.f32 %v92_v18, %v880_v16 }
  0x61   :  { %509 = vmatprep.subr.bf16.mxu0 %v750_v0  ;;  %529 = vmatprep.subr.bf16.mxu1 %v750_v0  ;;  %v596_v26 = vld [vmem:[#allocation10 + $0x28] sm:$0xff]   ;;  %v597_v27 = vld [vmem:[#allocation10 + $0x30] sm:$0xff]   ;;  %v598_v28 = vld [vmem:[#allocation10 + $0x38] sm:$0xff]  }
  0x62   :  { %v467_v31 = vld [vmem:[%s921_s5] ss:$0 sm:$0xff]  ;;  %s752_s5 = smov [#allocation11]  }
  0x63   :  { %v468_v41 = vld [vmem:[%s922_s6] ss:$0 sm:$0xff]  ;;  %s440_s14 = sshll.u32 %s752_s5, 4  ;;  %s441_s14 = int_to_ptr.vmem [resolvable:$true] %s440_s14 }
  0x64   :  { %510 = vmatpush3.bf16.msra.mxu0 %v579_v5  ;;  %530 = vmatpush3.bf16.msra.mxu1 %v580_v6  ;;  %s713_s6 = scalar_lea.vmem %s441_s14, 128  ;;  %p718_p13 = scmp.lt.s32.totalorder %s441_s14, %s441_s14 }
  0x65   :  { %511 = vmatprep.subr.bf16.mxu0 %v750_v0  ;;  %531 = vmatprep.subr.bf16.mxu1 %v750_v0  ;;  %p714_p12 = scmp.ne.s32.totalorder %s441_s14, %s713_s6  ;;  %p719_p0 = scmp.lt.s32.totalorder %s713_s6, %s713_s6 }
  0x67   :  { %p720_p1 = por %p719_p0, %p718_p13 }
  0x68   :  { %512 = vmatpush3.bf16.msra.mxu0 %v581_v7  ;;  %532 = vmatpush3.bf16.msra.mxu1 %v582_v8 }
  0x69   :  { %513 = vmatprep.subr.bf16.mxu0 %v750_v0  ;;  %533 = vmatprep.subr.bf16.mxu1 %v750_v0  ;;  %p721_p2 = pnand %p720_p1, %p714_p12 }
  0x6c   :  { %514 = vmatpush3.bf16.msra.mxu0 %v583_v9  ;;  %534 = vmatpush3.bf16.msra.mxu1 %v584_v10 }
  0x6d   :  { %515 = vmatprep.subr.bf16.mxu0 %v750_v0  ;;  %535 = vmatprep.subr.bf16.mxu1 %v750_v0 }
  0x70   :  { %516 = vmatpush3.bf16.msra.mxu0 %v585_v11  ;;  %536 = vmatpush3.bf16.msra.mxu1 %v586_v12 }
  0x71   :  { %517 = vmatprep.subr.bf16.mxu0 %v750_v0  ;;  %537 = vmatprep.subr.bf16.mxu1 %v750_v0 }
  0x74   :  { %518 = vmatpush3.bf16.msra.mxu0 %v587_v13  ;;  %538 = vmatpush3.bf16.msra.mxu1 %v588_v14 }
  0x75   :  { %519 = vmatprep.subr.bf16.mxu0 %v750_v0  ;;  %539 = vmatprep.subr.bf16.mxu1 %v750_v0 }
  0x78   :  { %520 = vmatpush3.bf16.msra.mxu0 %v589_v15  ;;  %540 = vmatpush3.bf16.msra.mxu1 %v590_v17 }
  0x79   :  { %545 = vmatprep.subr.bf16.mxu0 %v750_v0 }
  0x7b   :  { %522 = vmatmul.mubr.bf16.vlgmr.msra.gmra.mrb[0].mxu0 %v95_v19  ;;  %542 = vmatmul.mubr.bf16.vlgmr.msra.gmra.mrb[0].mxu1 %v94_v20 }
  0x7c   :  { %546 = vmatpush3.bf16.msra.mxu0 %v591_v21  ;;  %561 = vmatprep.mubr.msk.bf16.mxu0 %vm751_vm0, %v750_v0 }
  0x7d   :  { %547 = vmatprep.subr.bf16.mxu0 %v750_v0 }
  0x80   :  { %548 = vmatpush3.bf16.msra.mxu0 %v592_v22 }
  0x81   :  { %549 = vmatprep.subr.bf16.mxu0 %v750_v0 }
  0x84   :  { %550 = vmatpush3.bf16.msra.mxu0 %v593_v23 }
  0x85   :  { %551 = vmatprep.subr.bf16.mxu0 %v750_v0 }
  0x88   :  { %552 = vmatpush3.bf16.msra.mxu0 %v594_v24 }
  0x89   :  { %553 = vmatprep.subr.bf16.mxu0 %v750_v0 }
  0x8c   :  { %554 = vmatpush3.bf16.msra.mxu0 %v595_v25 }
  0x8d   :  { %555 = vmatprep.subr.bf16.mxu0 %v750_v0 }
  0x90   :  { %556 = vmatpush3.bf16.msra.mxu0 %v596_v26 }
  0x91   :  { %557 = vmatprep.subr.bf16.mxu0 %v750_v0 }
  0x94   :  { %558 = vmatpush3.bf16.msra.mxu0 %v597_v27 }
  0x95   :  { %559 = vmatprep.subr.bf16.mxu0 %v750_v0 }
  0x98   :  { %560 = vmatpush3.bf16.msra.mxu0 %v598_v28 }
 0x14e   :  { %v210_v29 = vpop.f32.mrb[0].mxu0  ;;  %v298_v30 = vpop.f32.mrb[0].mxu1 }
 0x14f   :  { %v523_v32 = vpop.f32.mrb[1].mxu0  ;;  %v299_v33 = vadd.f32 %v298_v30, %v210_v29  ;;  %v543_v34 = vpop.f32.mrb[1].mxu1 }
 0x150   :  { %v213_v35 = vpop.f32.mrb[2].mxu0  ;;  %v301_v36 = vpop.f32.mrb[2].mxu1 }
 0x151   :  { %v524_v37 = vpop.f32.mrb[3].mxu0  ;;  %v311_v38 = vadd.f32 %v467_v31, %v299_v33  ;;  %v544_v39 = vpop.f32.mrb[3].mxu1 }
 0x153   :  { %v312_v40 = vpack.c.bf16 %v311_v38, %v311_v38 }
 0x155   :  { %562 = vmatmul.mubr.bf16.vlgmr.msra.gmra.mrb[4].mxu0 %v312_v40 }
 0x228   :  { %v418_v42 = vpop.f32.mrb[4].mxu0 }
 0x229   :  { %v419_v43 = vadd.f32 %v468_v41, %v418_v42  ;;  %v563_v44 = vpop.f32.mrb[5].mxu0 }
 0x22a   :  { %v421_v45 = vpop.f32.mrb[6].mxu0 }
 0x22b   :  { %v477_v46 = vmul.f32 -1.442695, %v419_v43  ;;  %v564_v47 = vpop.f32.mrb[7].mxu0 }
 0x22d   :  { %599 = vpow2.f32 %v477_v46 }
 0x237   :  { %v600_v48 = vpop.eup %599 }
 0x238   :  { %v427_v49 = vadd.f32 1.0, %v600_v48 }
 0x23a   :  { %601 = vrcp.f32 %v427_v49 }
 0x244   :  { %v602_v51 = vpop.eup %601 }
 0x245   :  { %v431_v52 = vmul.f32 %v602_v51, %v430_v50 }
 0x247   :  { %v432_v53 = vadd.f32 %v431_v52, %v880_v16 }
 0x249   :  { %433 = vst [vmem:[#allocation11] sm:$0xff] %v432_v53 }
 0x24a   :  { %724 = shalt.err (!%p721_p2)
}
 0x24b   :  { %s725_s18 = scalar_lea.hbm %s923_s7, 128 }
 0x24c   :  { %p726_p3 = scmp.ne.s32.totalorder %s923_s7, %s725_s18  ;;  %p729_p4 = scmp.lt.u32.totalorder %s725_s18, %s923_s7 }
 0x24e   :  { %p731_p5 = pnand %p729_p4, %p726_p3 }
 0x250   :  { %734 = shalt.err (!%p731_p5)
}
 0x251   :  { %443 = dma.vmem_to_hbm [thread:$0]  %s441_s14, 128, %s923_s7, [#allocation4]  }
 0x252   :  { %741 = dma.done.wait [#allocation4], 128  }
 0x253   :  { %742 = vsyncadd [#allocation4], 4294967168 }
 0x254   :  { %447 = vsyncpa [#allocation3], 1 }
 0x255   :  { %448 = vsyncpa [#allocation6], 1 }
 0x256   :  { %449 = vsyncpa [#allocation9], 1 }
 0x257   :  { %450 = vsyncpa [#allocation4], 1 }

</bundles_post_ra>
